<compile_context>
chip_gen: v7x
topology: tpu7x:2x2x1
jax: 0.10.0
libtpu: 0.0.40
codegen_flags: <defaults>
</compile_context>

<pallas_src>
import math

import jax
import jax.numpy as jnp
from jax import lax
from jax.experimental import pallas as pl
from jax.experimental.pallas import tpu as pltpu


_MAX_TM = 512
_MAX_TN = 512
_MAX_TK = 1024


def _cdiv(a, b):
    return (a + b - 1) // b


def _round_up(a, b):
    return _cdiv(a, b) * b


def _sublane(dtype):
    """Native sublane packing for a dtype: 8 for 4-byte, 16 for 2-byte, 32 for 1-byte."""
    size = jnp.dtype(dtype).itemsize
    if size >= 4:
        return 8
    if size == 2:
        return 16
    return 32


def _best_tile_units(total_units, max_units):
    """Largest tile (in units) <= max_units that minimizes padding of total_units."""
    max_units = max(1, min(max_units, total_units))
    best_t, best_padded = 1, total_units * 2 + 1
    for t in range(1, max_units + 1):
        padded = _cdiv(total_units, t) * t
        if padded < best_padded or (padded == best_padded and t > best_t):
            best_t, best_padded = t, padded
    return best_t


def _vmem_capacity_bytes():
    try:
        return int(pltpu.get_tpu_info().vmem_capacity_bytes)
    except Exception:
        return 64 * 2**20  # conservative fallback (v7x per-TensorCore VMEM)


def _make_kernel(acc_in_out, compute_dtype):
    """Build the kernel body.

    acc_in_out: accumulate directly into the f32 output block (its index_map
                ignores k, so it is VMEM-resident across the reduction).
    compute_dtype: optional cast applied to the tiles before the MXU dot
                   (accumulation stays f32 via preferred_element_type).
    """

    def _maybe_cast(v):
        return v if compute_dtype is None else v.astype(compute_dtype)

    if acc_in_out:
        def kernel(x_ref, w_ref, b_ref, o_ref):
            k = pl.program_id(2)

            @pl.when(k == 0)
            def _():
                # Fold the bias into the accumulator init (no epilogue add).
                o_ref[...] = jnp.broadcast_to(
                    b_ref[...].astype(jnp.float32), o_ref.shape)

            # x tile (tm, tk) . w tile (tn, tk)^T  -> (tm, tn), f32 accumulation.
            o_ref[...] += lax.dot_general(
                _maybe_cast(x_ref[...]), _maybe_cast(w_ref[...]),
                (((1,), (1,)), ((), ())),
                preferred_element_type=jnp.float32)

        return kernel

    def kernel(x_ref, w_ref, b_ref, o_ref, acc_ref):
        k = pl.program_id(2)

        @pl.when(k == 0)
        def _():
            acc_ref[...] = jnp.broadcast_to(
                b_ref[...].astype(jnp.float32), acc_ref.shape)

        acc_ref[...] += lax.dot_general(
            _maybe_cast(x_ref[...]), _maybe_cast(w_ref[...]),
            (((1,), (1,)), ((), ())),
            preferred_element_type=jnp.float32)

        @pl.when(k == pl.num_programs(2) - 1)
        def _():
            o_ref[...] = acc_ref[...].astype(o_ref.dtype)

    return kernel


def _meta_linear_pallas(x, weight, bias, *, tm=None, tn=None, tk=None,
                        compute_dtype=None):
    """Pallas path: x (M, K), weight (N, K) [PyTorch layout], bias (N,) -> (M, N)."""
    M, K = x.shape
    N, K2 = weight.shape
    assert K == K2, "in_features mismatch"
    out_dtype = x.dtype
    acc_in_out = jnp.dtype(out_dtype) == jnp.dtype(jnp.float32)

    # ---- Tile selection: padding-aware, dtype-aware sublane alignment. ----
    sub = max(_sublane(x.dtype), _sublane(out_dtype))
    auto_tn = tn is None
    if tm is None:
        tm = sub * _best_tile_units(_cdiv(M, sub), _MAX_TM // sub)
    if tn is None:
        tn = 128 * _best_tile_units(_cdiv(N, 128), _MAX_TN // 128)
    if tk is None:
        tk = 128 * _best_tile_units(_cdiv(K, 128), _MAX_TK // 128)

    # Megacore (v7x has 2 TensorCores): if both parallel axes collapse to a
    # single block, split N so the (i, j) grid has >= 2 blocks.
    if auto_tn and _cdiv(M, tm) == 1 and _cdiv(N, tn) == 1 and _cdiv(N, 128) >= 2:
        n_units = _cdiv(N, 128)
        tn = 128 * _best_tile_units(n_units, max(1, n_units // 2))

    # ---- VMEM budgeting: keep the double-buffered working set well under the
    # per-core VMEM capacity (re-derived per generation; v7x has only 64 MiB). --
    x_isz = jnp.dtype(x.dtype).itemsize
    w_isz = jnp.dtype(weight.dtype).itemsize
    o_isz = jnp.dtype(out_dtype).itemsize

    def work_bytes(tm_, tn_, tk_):
        acc_extra = 0 if acc_in_out else tm_ * tn_ * 4
        return (2 * (tm_ * tk_ * x_isz + tn_ * tk_ * w_isz + tm_ * tn_ * o_isz)
                + acc_extra + 2 * tn_ * 4)

    cap = _vmem_capacity_bytes()
    budget = int(0.45 * cap)
    while work_bytes(tm, tn, tk) > budget and tk > 128:
        tk = _round_up(tk // 2, 128)
    while work_bytes(tm, tn, tk) > budget and tm > sub:
        tm = _round_up(tm // 2, sub)

    Mp, Np, Kp = _round_up(M, tm), _round_up(N, tn), _round_up(K, tk)
    grid = (Mp // tm, Np // tn, Kp // tk)

    # ---- Pad only what is actually misaligned. The weight stays (N, K): no
    # per-call transpose / HBM re-materialization of the parameter. ----
    x_p = x if (Mp == M and Kp == K) else jnp.pad(x, ((0, Mp - M), (0, Kp - K)))
    w_p = weight if (Np == N and Kp == K) else jnp.pad(
        weight, ((0, Np - N), (0, Kp - K)))
    b = bias if bias is not None else jnp.zeros((N,), out_dtype)
    b_p = b.reshape(1, N)
    if Np != N:
        b_p = jnp.pad(b_p, ((0, 0), (0, Np - N)))

    gi, gj, gk = grid
    bytes_accessed = int(
        gj * x_p.size * x_p.dtype.itemsize          # x re-read per N block
        + gi * w_p.size * w_p.dtype.itemsize        # w re-read per M block
        + Mp * Np * o_isz                           # output written once
        + gi * gj * b_p.size * b_p.dtype.itemsize)  # bias per (i, j)

    vmem_limit = int(min(0.7 * cap, max(32 * 2**20, 2 * work_bytes(tm, tn, tk))))

    kernel = _make_kernel(acc_in_out, compute_dtype)

    out = pl.pallas_call(
        kernel,
        out_shape=jax.ShapeDtypeStruct((Mp, Np), out_dtype),
        grid_spec=pltpu.PrefetchScalarGridSpec(
            num_scalar_prefetch=0,
            grid=grid,
            in_specs=[
                pl.BlockSpec((tm, tk), lambda i, j, k: (i, k)),  # x (M, K) tile
                pl.BlockSpec((tn, tk), lambda i, j, k: (j, k)),  # w (N, K) tile (trans_b dot)
                pl.BlockSpec((1, tn), lambda i, j, k: (0, j)),   # bias tile (k-invariant)
            ],
            out_specs=pl.BlockSpec((tm, tn), lambda i, j, k: (i, j)),
            scratch_shapes=(
                [] if acc_in_out else [pltpu.VMEM((tm, tn), jnp.float32)]),
        ),
        compiler_params=pltpu.CompilerParams(
            dimension_semantics=("parallel", "parallel", "arbitrary"),
            vmem_limit_bytes=vmem_limit,
        ),
        cost_estimate=pl.CostEstimate(
            flops=2 * Mp * Np * Kp,
            transcendentals=0,
            bytes_accessed=bytes_accessed,
        ),
    )(x_p, w_p, b_p)

    if Mp != M or Np != N:
        out = out[:M, :N]
    return out


def meta_linear(x, weight, bias=None, *, tm=None, tn=None, tk=None,
                compute_dtype=None, force_pallas=False):
    """y = F.linear(x, weight, bias); supports arbitrary leading dims on x."""
    orig_shape = x.shape
    K = orig_shape[-1]
    N = weight.shape[0]
    x2d = x.reshape(-1, K)
    M = x2d.shape[0]

    # Tiny problems: per-grid-step overhead dominates; XLA's fused GEMM wins.
    if not force_pallas and (M * N * K) < (1 << 18):
        y2d = x2d @ weight.T
        if bias is not None:
            y2d = y2d + bias.reshape(1, N)
    else:
        y2d = _meta_linear_pallas(x2d, weight, bias, tm=tm, tn=tn, tk=tk,
                                  compute_dtype=compute_dtype)
    return y2d.reshape(*orig_shape[:-1], N)


def init_meta_linear_params(key, in_features, out_features, dtype=jnp.float32):
    """Deterministic init mirroring nn.Linear's default U(-1/sqrt(fan_in), 1/sqrt(fan_in))."""
    kw, kb = jax.random.split(key)
    bound = 1.0 / math.sqrt(in_features)
    weight = jax.random.uniform(
        kw, (out_features, in_features), dtype, minval=-bound, maxval=bound)
    bias = jax.random.uniform(
        kb, (out_features,), dtype, minval=-bound, maxval=bound)
    return weight, bias


if __name__ == "__main__":
    key = jax.random.PRNGKey(0)
    k_x1, k_p1, k_x2, k_p2, k_x3, k_p3 = jax.random.split(key, 6)

    # --- Case 1: small shapes consistent with the module (batch=8, 32 -> 64).
    #     Force the Pallas path so the kernel is actually exercised.
    batch, in_features, out_features = 8, 32, 64
    x1 = jax.random.normal(k_x1, (batch, in_features), jnp.float32)
    w1, b1 = init_meta_linear_params(k_p1, in_features, out_features)
    y1 = jax.block_until_ready(meta_linear(x1, w1, b1, force_pallas=True))
    y1_ref = x1 @ w1.T + b1
    assert y1.shape == (batch, out_features)
    assert jnp.allclose(y1, y1_ref, atol=1e-5, rtol=1e-5), "case1 mismatch vs reference"

    # --- Case 2: multi-block grid on j (N split for megacore) and k (K-streamed
    #     f32 accumulator directly in the output block).
    M2, K2, N2 = 256, 1536, 384
    x2 = jax.random.normal(k_x2, (M2, K2), jnp.float32)
    w2, b2 = init_meta_linear_params(k_p2, K2, N2)
    y2 = jax.block_until_ready(meta_linear(x2, w2, b2, force_pallas=True))
    y2_ref = x2 @ w2.T + b2
    assert y2.shape == (M2, N2)
    assert jnp.allclose(y2, y2_ref, atol=5e-4, rtol=5e-4), "case2 mismatch vs reference"

    # --- Case 3: bf16 activations/weights exercise the scratch-accumulator
    #     variant and the 16-sublane tm alignment.
    M3, K3, N3 = 128, 256, 256
    x3 = jax.random.normal(k_x3, (M3, K3), jnp.float32).astype(jnp.bfloat16)
    w3f, b3f = init_meta_linear_params(k_p3, K3, N3)
    w3, b3 = w3f.astype(jnp.bfloat16), b3f.astype(jnp.bfloat16)
    y3 = jax.block_until_ready(meta_linear(x3, w3, b3, force_pallas=True))
    y3_ref = (x3.astype(jnp.float32) @ w3.astype(jnp.float32).T
              + b3.astype(jnp.float32))
    assert y3.shape == (M3, N3)
    assert jnp.allclose(y3.astype(jnp.float32), y3_ref, atol=5e-2, rtol=5e-2), \
        "case3 mismatch vs reference"

    print("KERNEL_OK")
</pallas_src>

<mosaic_0001>
module attributes {stable_mosaic.version = 11 : i64} {
  func.func @kernel(%arg0: i32, %arg1: i32, %arg2: i32, %arg3: memref<8x128xf32, #tpu.memory_space<vmem>>, %arg4: memref<128x128xf32, #tpu.memory_space<vmem>>, %arg5: memref<1x128xf32, #tpu.memory_space<vmem>>, %arg6: memref<8x128xf32, #tpu.memory_space<vmem>>) attributes {dimension_semantics = [#tpu.dimension_semantics<parallel>, #tpu.dimension_semantics<parallel>, #tpu.dimension_semantics<arbitrary>], iteration_bounds = array<i64: 1, 1, 1>, scalar_prefetch = 0 : i64, scratch_operands = 0 : i64, tpu.core_type = #tpu.core_type<tc>, window_params = [{transform_indices = @transform_0, window_bounds = array<i64: 8, 128>}, {transform_indices = @transform_1, window_bounds = array<i64: 128, 128>}, {transform_indices = @transform_2, window_bounds = array<i64: 1, 128>}, {transform_indices = @transform_3, window_bounds = array<i64: 8, 128>}]} {
    %c0_i32 = arith.constant 0 : i32
    %0 = arith.cmpi eq, %arg2, %c0_i32 : i32
    %1 = arith.extui %0 : i1 to i32
    %c0_i32_0 = arith.constant 0 : i32
    %2 = arith.cmpi ne, %1, %c0_i32_0 : i32
    scf.if %2 {
      %c0_8 = arith.constant 0 : index
      %c0_9 = arith.constant 0 : index
      %9 = vector.load %arg5[%c0_8, %c0_9] : memref<1x128xf32, #tpu.memory_space<vmem>>, vector<1x128xf32>
      %10 = vector.shape_cast %9 : vector<1x128xf32> to vector<1x128xf32>
      %11 = vector.broadcast %10 : vector<1x128xf32> to vector<8x128xf32>
      %c0_10 = arith.constant 0 : index
      %c0_11 = arith.constant 0 : index
      %12 = vector.load %arg6[%c0_10, %c0_11] : memref<8x128xf32, #tpu.memory_space<vmem>>, vector<8x128xf32>
      tpu.vector_store %arg6[%c0_10, %c0_11], %11 {strides = array<i32>} : memref<8x128xf32, #tpu.memory_space<vmem>>, vector<8x128xf32>,
    } else {
    }
    %c0 = arith.constant 0 : index
    %c0_1 = arith.constant 0 : index
    %3 = vector.load %arg6[%c0, %c0_1] : memref<8x128xf32, #tpu.memory_space<vmem>>, vector<8x128xf32>
    %c0_2 = arith.constant 0 : index
    %c0_3 = arith.constant 0 : index
    %4 = vector.load %arg3[%c0_2, %c0_3] : memref<8x128xf32, #tpu.memory_space<vmem>>, vector<8x128xf32>
    %c0_4 = arith.constant 0 : index
    %c0_5 = arith.constant 0 : index
    %5 = vector.load %arg4[%c0_4, %c0_5] : memref<128x128xf32, #tpu.memory_space<vmem>>, vector<128x128xf32>
    %cst = arith.constant dense<0.000000e+00> : vector<8x128xf32>
    %6 = tpu.matmul %4, %5, %cst {dimension_numbers = #tpu.dot_dimension_numbers<[1], [1], [0], [0], [0, 0, 1, 0], [], []>} : vector<8x128xf32>, vector<128x128xf32>, vector<8x128xf32> -> vector<8x128xf32>
    %7 = arith.addf %3, %6 : vector<8x128xf32>
    %c0_6 = arith.constant 0 : index
    %c0_7 = arith.constant 0 : index
    %8 = vector.load %arg6[%c0_6, %c0_7] : memref<8x128xf32, #tpu.memory_space<vmem>>, vector<8x128xf32>
    tpu.vector_store %arg6[%c0_6, %c0_7], %7 {strides = array<i32>} : memref<8x128xf32, #tpu.memory_space<vmem>>, vector<8x128xf32>,
    return
  }
  func.func @transform_0(%arg0: i32, %arg1: i32, %arg2: i32) -> (i32, i32) {
    %c0_i32 = arith.constant 0 : i32
    return %arg0, %arg2 : i32, i32
  }
  func.func @transform_1(%arg0: i32, %arg1: i32, %arg2: i32) -> (i32, i32) {
    %c0_i32 = arith.constant 0 : i32
    return %arg1, %arg2 : i32, i32
  }
  func.func @transform_2(%arg0: i32, %arg1: i32, %arg2: i32) -> (i32, i32) {
    %c0_i32 = arith.constant 0 : i32
    %c0_i32_0 = arith.constant 0 : i32
    return %c0_i32, %arg1 : i32, i32
  }
  func.func @transform_3(%arg0: i32, %arg1: i32, %arg2: i32) -> (i32, i32) {
    %c0_i32 = arith.constant 0 : i32
    return %arg0, %arg1 : i32, i32
  }
}

</mosaic_0001>

<bundles_post_ra>
// kernel: tpu_custom_call.1
= control target key start
LH: loop header
LB: loop body
LE: loop exit
PB: predicated region body
PF: predicated region fallthrough
CT: control target
= control target key end

     0   :  { %8 = vsyncpa [#allocation3], 0  ;;  %s390_s0 = inlined_call_operand.hbm [shape: f32[8,128], index: 0, kind: input, shape index: {}]   ;;  %s391_s1 = inlined_call_operand.hbm [shape: f32[128,128], index: 1, kind: input, shape index: {}]   ;;  %s392_s2 = inlined_call_operand.vmem [shape: f32[1,128], index: 2, kind: input, shape index: {}]   ;;  %s393_s3 = inlined_call_operand.hbm [shape: f32[8,128], index: 3, kind: output, shape index: {}]  }
   0x1   :  { %9 = vsyncpa [#allocation6], 0 }
   0x2   :  { %10 = vsyncpa [#allocation4], 0  ;;  %s316_s12 = smov [#allocation2]   ;;  %s317_s14 = smov [#allocation5]  }
   0x3   :  { %s17_s13 = sshll.u32 %s316_s12, 4  ;;  %s26_s15 = sshll.u32 %s317_s14, 4  ;;  %s18_s13 = int_to_ptr.vmem [resolvable:$true] %s17_s13  ;;  %s344_s15 = int_to_ptr.vmem [resolvable:$true] %s26_s15 }
   0x4   :  { %s244_s18 = scalar_lea.hbm %s390_s0, 128 }
   0x5   :  { %p245_p0 = scmp.ne.s32.totalorder %s390_s0, %s244_s18  ;;  %p248_p1 = scmp.lt.u32.totalorder %s244_s18, %s390_s0 }
   0x7   :  { %p250_p2 = pnand %p248_p1, %p245_p0 }
   0x9   :  { %253 = shalt.err (!%p250_p2)
}
   0xa   :  { %s254_s23 = scalar_lea.vmem %s18_s13, 128  ;;  %p259_p4 = scmp.lt.s32.totalorder %s18_s13, %s18_s13 }
   0xb   :  { %p255_p3 = scmp.ne.s32.totalorder %s18_s13, %s254_s23  ;;  %p260_p5 = scmp.lt.s32.totalorder %s254_s23, %s254_s23 }
   0xd   :  { %p261_p6 = por %p260_p5, %p259_p4 }
   0xf   :  { %p262_p7 = pnand %p261_p6, %p255_p3 }
  0x11   :  { %265 = shalt.err (!%p262_p7)
}
  0x12   :  { %20 = dma.hbm_to_vmem [thread:$0]  %s390_s0, 128, %s18_s13, [#allocation3]  }
  0x13   :  { %s266_s28 = scalar_lea.hbm %s391_s1, 2048 }
  0x14   :  { %p267_p8 = scmp.ne.s32.totalorder %s391_s1, %s266_s28  ;;  %p270_p9 = scmp.lt.u32.totalorder %s266_s28, %s391_s1 }
  0x16   :  { %p272_p10 = pnand %p270_p9, %p267_p8 }
  0x18   :  { %275 = shalt.err (!%p272_p10)
}
  0x19   :  { %s276_s6 = scalar_lea.vmem %s344_s15, 2048  ;;  %p281_p12 = scmp.lt.s32.totalorder %s344_s15, %s344_s15 }
  0x1a   :  { %p277_p11 = scmp.ne.s32.totalorder %s344_s15, %s276_s6  ;;  %p282_p13 = scmp.lt.s32.totalorder %s276_s6, %s276_s6 }
  0x1c   :  { %p283_p0 = por %p282_p13, %p281_p12 }
  0x1e   :  { %p284_p1 = pnand %p283_p0, %p277_p11 }
  0x20   :  { %287 = shalt.err (!%p284_p1)
}
  0x21   :  { %s318_s0 = smov 128   ;;  %s319_s7 = smov 8  }
  0x22   :  { %32 = dma.hbm_to_vmem [thread:$0]  %s391_s1, 2048, %s344_s15, [#allocation6], %s318_s0, %s318_s0, %s319_s7  }
  0x23   :  { %310 = dma.done.wait [#allocation3], 128  }
  0x24   :  { %311 = vsyncadd [#allocation3], 4294967168 }
  0x25   :  { %312 = dma.done.wait [#allocation6], 2048  }
  0x26   :  { %313 = vsyncadd [#allocation6], 4294965248  ;;  %v320_v0 = vmov 0.0|0.0   ;;  %vm321_vm0 = vmmov 0   ;;  %v322_v1 = vmov 0.0   ;;  %v55_v2 = vld [vmem:[#allocation5] sm:$0xff] }
  0x27   :  { %212 = vmatprep.subr.bf16.mxu0 %v320_v0  ;;  %209 = vmatprep.mubr.msk.f32.mxu0 %vm321_vm0, %v322_v1  ;;  %v56_v3 = vld [vmem:[#allocation5 + $0x8] sm:$0xff]  ;;  %v57_v5 = vld [vmem:[#allocation5 + $0x10] sm:$0xff]  ;;  %v58_v6 = vld [vmem:[#allocation5 + $0x18] sm:$0xff]  ;;  %s323_s11 = smov [#allocation7]  }
  0x28   :  { %v213_v4 = vpack.c.bf16 %v56_v3, %v55_v2  ;;  %v216_v7 = vpack.c.bf16 %v58_v6, %v57_v5  ;;  %v59_v8 = vld [vmem:[#allocation5 + $0x20] sm:$0xff]  ;;  %v60_v9 = vld [vmem:[#allocation5 + $0x28] sm:$0xff]  ;;  %v61_v11 = vld [vmem:[#allocation5 + $0x30] sm:$0xff]  ;;  %s149_s12 = sshll.u32 %s323_s11, 4  ;;  %s150_s12 = int_to_ptr.vmem [resolvable:$true] %s149_s12 }
  0x29   :  { %v219_v10 = vpack.c.bf16 %v60_v9, %v59_v8  ;;  %v62_v12 = vld [vmem:[#allocation5 + $0x38] sm:$0xff]  ;;  %v63_v14 = vld [vmem:[#allocation5 + $0x40] sm:$0xff]  ;;  %v64_v15 = vld [vmem:[#allocation5 + $0x48] sm:$0xff]  ;;  %s288_s13 = scalar_lea.vmem %s150_s12, 128  ;;  %p293_p3 = scmp.lt.s32.totalorder %s150_s12, %s150_s12 }
  0x2a   :  { %214 = vmatpush3.bf16.xpose.msra.mxu0 %v213_v4  ;;  %v222_v13 = vpack.c.bf16 %v62_v12, %v61_v11  ;;  %v225_v16 = vpack.c.bf16 %v64_v15, %v63_v14  ;;  %v65_v17 = vld [vmem:[#allocation5 + $0x50] sm:$0xff]  ;;  %v66_v18 = vld [vmem:[#allocation5 + $0x58] sm:$0xff]  ;;  %v67_v20 = vld [vmem:[#allocation5 + $0x60] sm:$0xff]  ;;  %p289_p2 = scmp.ne.s32.totalorder %s150_s12, %s288_s13  ;;  %p294_p4 = scmp.lt.s32.totalorder %s288_s13, %s288_s13 }
  0x2b   :  { %215 = vmatprep.subr.bf16.mxu0 %v320_v0  ;;  %v228_v19 = vpack.c.bf16 %v66_v18, %v65_v17  ;;  %v68_v21 = vld [vmem:[#allocation5 + $0x68] sm:$0xff]  ;;  %v69_v23 = vld [vmem:[#allocation5 + $0x70] sm:$0xff]  ;;  %v70_v24 = vld [vmem:[#allocation5 + $0x78] sm:$0xff] }
  0x2c   :  { %v231_v22 = vpack.c.bf16 %v68_v21, %v67_v20  ;;  %v234_v25 = vpack.c.bf16 %v70_v24, %v69_v23  ;;  %v54_v26 = vld [vmem:[#allocation2] sm:$0xff]  ;;  %p295_p5 = por %p294_p4, %p293_p3 }
  0x2d   :  { %v159_v27 = vld [vmem:[%s392_s2] ss:$0 sm:$0xff] }
  0x2e   :  { %p296_p6 = pnand %p295_p5, %p289_p2 }
  0x32   :  { %217 = vmatpush3.bf16.xpose.msra.mxu0 %v216_v7 }
  0x33   :  { %218 = vmatprep.subr.bf16.mxu0 %v320_v0 }
  0x3a   :  { %220 = vmatpush3.bf16.xpose.msra.mxu0 %v219_v10 }
  0x3b   :  { %221 = vmatprep.subr.bf16.mxu0 %v320_v0 }
  0x42   :  { %223 = vmatpush3.bf16.xpose.msra.mxu0 %v222_v13 }
  0x43   :  { %224 = vmatprep.subr.bf16.mxu0 %v320_v0 }
  0x4a   :  { %226 = vmatpush3.bf16.xpose.msra.mxu0 %v225_v16 }
  0x4b   :  { %227 = vmatprep.subr.bf16.mxu0 %v320_v0 }
  0x52   :  { %229 = vmatpush3.bf16.xpose.msra.mxu0 %v228_v19 }
  0x53   :  { %230 = vmatprep.subr.bf16.mxu0 %v320_v0 }
  0x5a   :  { %232 = vmatpush3.bf16.xpose.msra.mxu0 %v231_v22 }
  0x5b   :  { %233 = vmatprep.subr.bf16.mxu0 %v320_v0 }
  0x62   :  { %235 = vmatpush3.bf16.xpose.msra.mxu0 %v234_v25 }
  0x69   :  { %210 = vmatmul.mubr.f32.vlgmr.msra.gmra.mrb[0].mxu0 %v54_v26 }
 0x13c   :  { %v137_v28 = vpop.f32.mrb[0].mxu0 }
 0x13d   :  { %v141_v29 = vadd.f32 %v159_v27, %v137_v28  ;;  %v211_v30 = vpop.f32.mrb[1].mxu0 }
 0x13f   :  { %142 = vst [vmem:[#allocation7] sm:$0xff] %v141_v29 }
 0x140   :  { %299 = shalt.err (!%p296_p6)
}
 0x141   :  { %s300_s16 = scalar_lea.hbm %s393_s3, 128 }
 0x142   :  { %p301_p7 = scmp.ne.s32.totalorder %s393_s3, %s300_s16  ;;  %p304_p8 = scmp.lt.u32.totalorder %s300_s16, %s393_s3 }
 0x144   :  { %p306_p9 = pnand %p304_p8, %p301_p7 }
 0x146   :  { %309 = shalt.err (!%p306_p9)
}
 0x147   :  { %152 = dma.vmem_to_hbm [thread:$0]  %s150_s12, 128, %s393_s3, [#allocation4]  }
 0x148   :  { %314 = dma.done.wait [#allocation4], 128  }
 0x149   :  { %315 = vsyncadd [#allocation4], 4294967168 }
 0x14a   :  { %156 = vsyncpa [#allocation3], 1 }
 0x14b   :  { %157 = vsyncpa [#allocation6], 1 }
 0x14c   :  { %158 = vsyncpa [#allocation4], 1 }

</bundles_post_ra>
